<compile_context>
chip_gen: v7x
topology: tpu7x:2x2x1
jax: 0.10.0
libtpu: 0.0.40
codegen_flags: <defaults>
</compile_context>

<pallas_src>
import numpy as np
import jax
import jax.numpy as jnp
from jax.experimental import pallas as pl
from jax.experimental.pallas import tpu as pltpu


def _point_embed_kernel(x_ref, basis2_ref, phase_ref, w_sc_ref, w_xo_ref, o_ref):
    x = x_ref[...].astype(jnp.float32)                      # (TN, 3+other)
    x3 = x[:, :3]                                           # free static slice of the VMEM tile
    # Fourier phases for sin AND cos in one shot: cos(p) == sin(p + pi/2)
    pc = jnp.dot(x3, basis2_ref[...],
                 preferred_element_type=jnp.float32) + phase_ref[...]
    s = jnp.sin(pc)                                         # (TN, hidden)
    out = (jnp.dot(s, w_sc_ref[...], preferred_element_type=jnp.float32)
           + jnp.dot(x, w_xo_ref[...], preferred_element_type=jnp.float32))
    o_ref[...] = out.astype(o_ref.dtype)


def _round_up(v, m):
    return ((v + m - 1) // m) * m


def _choose_tile(n, target_tile=2048, min_steps=4):
    """N-tile size; n need NOT be a multiple (partial last block is fine)."""
    n8 = _round_up(max(n, 8), 8)
    if n8 <= 1024:
        # Small problem: one grid step.  Splitting only adds ~0.35us/step
        # overhead on 1-TC chips (v5e/v6e); absolute time here is ~1us anyway.
        return n8
    # Large problem: aim for >= min_steps steps (>= 2 per TensorCore on v7x so
    # the output DMA pipelines under compute), but keep each step's output
    # block >= 1024 rows (~0.5 MB) so per-step overhead stays small, and cap at
    # target_tile for VMEM.
    tile = _round_up(pl.cdiv(n8, min_steps), 8)
    return int(min(target_tile, max(1024, tile)))


class PointEmbedPallas:
    def __init__(self, hidden_dim=48, dim=128, other_dim=0, key=None,
                 target_tile=2048):
        assert hidden_dim % 6 == 0
        self.hidden_dim = hidden_dim
        self.dim = dim
        self.other_dim = other_dim
        self.target_tile = target_tile

        # basis buffer: (3, hidden_dim // 2), block-diagonal powers-of-two * pi
        k = hidden_dim // 6
        e = (2.0 ** np.arange(k, dtype=np.float32)) * np.pi
        z = np.zeros(k, dtype=np.float32)
        basis = np.stack([np.concatenate([e, z, z]),
                          np.concatenate([z, e, z]),
                          np.concatenate([z, z, e])], axis=0)
        self.basis = jnp.asarray(basis, jnp.float32)                    # (3, h/2)

        # Fused sin/cos basis + phase bias: cos(p) = sin(p + pi/2)
        h2 = hidden_dim // 2
        self.basis2 = jnp.concatenate([self.basis, self.basis], axis=1)  # (3, h)
        self.phase = jnp.concatenate(
            [jnp.zeros((1, h2), jnp.float32),
             jnp.full((1, h2), np.pi / 2, jnp.float32)], axis=1)         # (1, h)

        # MPConv weight: (out=dim, in=hidden_dim+3+other_dim), randn init.
        # TODO(synk): training-mode MPConv re-normalizes and copies self.weight
        # back in place; only the eval-mode forward math is implemented here.
        in_ch = hidden_dim + 3 + other_dim
        if key is None:
            key = jax.random.PRNGKey(42)
        weight = jax.random.normal(key, (dim, in_ch), jnp.float32)

        # Eval-time MPConv normalization:
        #   norm = eps + ||row||_2 * sqrt(norm.numel()/w.numel()) = eps + ||row||/sqrt(in)
        #   w_eff = (w / norm) * (gain / sqrt(in)),  gain = 1
        row_norm = jnp.sqrt(jnp.sum(weight * weight, axis=1, keepdims=True))
        denom = 1e-4 + row_norm / np.sqrt(in_ch)
        w_eff = (weight / denom) * (1.0 / np.sqrt(in_ch))                # (dim, in_ch)

        # Concat order of features is [sin(p) (h/2) | cos(p) (h/2) | x3 | others]
        # -> fused sin/cos weight is simply the first `hidden_dim` input columns.
        self.w_sc = jnp.transpose(w_eff[:, :hidden_dim])                 # (h, dim)
        self.w_xo = jnp.transpose(w_eff[:, hidden_dim:])                 # (3+other, dim)
        self.w_full = jnp.transpose(w_eff)                               # (in_ch, dim)

    def __call__(self, x, out_dtype=None):
        n, c = x.shape
        assert c == 3 + self.other_dim, "input channel dim must be 3 + other_dim"
        # Default keeps module semantics (x.dtype).  Recommended fast path when
        # the consumer tolerates it: out_dtype=jnp.bfloat16 halves the dominant
        # HBM output write (~1.8x on v5e/v6e where HBM is binding).
        out_dtype = x.dtype if out_dtype is None else jnp.dtype(out_dtype)

        tn = _choose_tile(n, self.target_tile)
        grid = (pl.cdiv(n, tn),)     # partial last block: garbage read, masked store

        hidden, dim = self.hidden_dim, self.dim
        flops = 2 * n * (3 * hidden + hidden * dim + c * dim)
        transcendentals = n * hidden
        bytes_accessed = (n * c * x.dtype.itemsize
                          + n * dim * jnp.dtype(out_dtype).itemsize
                          + 4 * (self.basis2.size + self.phase.size
                                 + self.w_sc.size + self.w_xo.size))
        cost = pl.CostEstimate(flops=flops,
                               transcendentals=transcendentals,
                               bytes_accessed=bytes_accessed)

        return pl.pallas_call(
            _point_embed_kernel,
            out_shape=jax.ShapeDtypeStruct((n, dim), out_dtype),
            grid_spec=pltpu.PrefetchScalarGridSpec(
                num_scalar_prefetch=0,
                grid=grid,
                in_specs=[
                    pl.BlockSpec((tn, c), lambda i: (i, 0)),
                    pl.BlockSpec(self.basis2.shape, lambda i: (0, 0)),
                    pl.BlockSpec(self.phase.shape, lambda i: (0, 0)),
                    pl.BlockSpec(self.w_sc.shape, lambda i: (0, 0)),
                    pl.BlockSpec(self.w_xo.shape, lambda i: (0, 0)),
                ],
                out_specs=pl.BlockSpec((tn, dim), lambda i: (i, 0)),
            ),
            compiler_params=pltpu.CompilerParams(
                dimension_semantics=("parallel",),
                vmem_limit_bytes=32 * 1024 * 1024),
            cost_estimate=cost,
        )(x, self.basis2, self.phase, self.w_sc, self.w_xo)

    # Pure-JAX reference of the exact PyTorch forward (for verification).
    def reference(self, x):
        x3 = x[:, :3].astype(jnp.float32)
        p = x3 @ self.basis
        feats = jnp.concatenate(
            [jnp.sin(p), jnp.cos(p), x.astype(jnp.float32)], axis=1)
        return feats @ self.w_full


if __name__ == "__main__":
    key = jax.random.PRNGKey(0)
    k_x1, k_x2, k_w = jax.random.split(key, 3)
    k_x3 = jax.random.fold_in(key, 123)

    model = PointEmbedPallas(hidden_dim=48, dim=128, other_dim=0, key=k_w)

    # Small aligned case (N multiple of 8), single grid step.
    x_small = jax.random.normal(k_x1, (8, 3), jnp.float32)
    out_small = jax.block_until_ready(model(x_small))
    assert out_small.shape == (8, 128), out_small.shape
    np.testing.assert_allclose(np.asarray(out_small),
                               np.asarray(model.reference(x_small)),
                               rtol=1e-4, atol=1e-4)

    # Small ragged case: exercises the partial-block path (no pad, no slice).
    x_ragged = jax.random.normal(k_x2, (13, 3), jnp.float32)
    out_ragged = jax.block_until_ready(model(x_ragged))
    assert out_ragged.shape == (13, 128), out_ragged.shape
    np.testing.assert_allclose(np.asarray(out_ragged),
                               np.asarray(model.reference(x_ragged)),
                               rtol=1e-4, atol=1e-4)

    # Multi-step ragged case with realistic point-cloud coords in [-1, 1]
    # (per review: validate the fused sin(p + pi/2) trick at realistic ranges).
    # Slightly looser tolerance: f32 trig argument reduction at |p| up to
    # 2^7*pi plus default-precision f32 matmuls.
    x_med = jax.random.uniform(k_x3, (1031, 3), jnp.float32,
                               minval=-1.0, maxval=1.0)
    out_med = jax.block_until_ready(model(x_med))
    assert out_med.shape == (1031, 128), out_med.shape
    ref_med = model.reference(x_med)
    np.testing.assert_allclose(np.asarray(out_med), np.asarray(ref_med),
                               rtol=5e-4, atol=5e-4)

    # Recommended fast path: bf16 output (halves the dominant HBM write).
    out_bf16 = jax.block_until_ready(model(x_med, out_dtype=jnp.bfloat16))
    assert out_bf16.dtype == jnp.bfloat16, out_bf16.dtype
    np.testing.assert_allclose(np.asarray(out_bf16.astype(jnp.float32)),
                               np.asarray(ref_med),
                               rtol=2e-2, atol=2e-2)

    print("KERNEL_OK")
</pallas_src>

<mosaic_0001>
module attributes {stable_mosaic.version = 11 : i64} {
  func.func @_point_embed_kernel(%arg0: i32, %arg1: memref<8x3xf32, #tpu.memory_space<vmem>>, %arg2: memref<3x48xf32, #tpu.memory_space<vmem>>, %arg3: memref<1x48xf32, #tpu.memory_space<vmem>>, %arg4: memref<48x128xf32, #tpu.memory_space<vmem>>, %arg5: memref<3x128xf32, #tpu.memory_space<vmem>>, %arg6: memref<8x128xf32, #tpu.memory_space<vmem>>) attributes {dimension_semantics = [#tpu.dimension_semantics<parallel>], iteration_bounds = array<i64: 1>, scalar_prefetch = 0 : i64, scratch_operands = 0 : i64, tpu.core_type = #tpu.core_type<tc>, window_params = [{transform_indices = @transform_0, window_bounds = array<i64: 8, 3>}, {pipeline_mode = #tpu.pipeline_mode<synchronous>, transform_indices = @transform_1, window_bounds = array<i64: 3, 48>}, {pipeline_mode = #tpu.pipeline_mode<synchronous>, transform_indices = @transform_2, window_bounds = array<i64: 1, 48>}, {pipeline_mode = #tpu.pipeline_mode<synchronous>, transform_indices = @transform_3, window_bounds = array<i64: 48, 128>}, {pipeline_mode = #tpu.pipeline_mode<synchronous>, transform_indices = @transform_4, window_bounds = array<i64: 3, 128>}, {transform_indices = @transform_5, window_bounds = array<i64: 8, 128>}]} {
    %c0 = arith.constant 0 : index
    %c0_0 = arith.constant 0 : index
    %0 = vector.load %arg1[%c0, %c0_0] : memref<8x3xf32, #tpu.memory_space<vmem>>, vector<8x3xf32>
    %c0_1 = arith.constant 0 : index
    %c0_2 = arith.constant 0 : index
    %1 = vector.load %arg2[%c0_1, %c0_2] : memref<3x48xf32, #tpu.memory_space<vmem>>, vector<3x48xf32>
    %cst = arith.constant dense<0.000000e+00> : vector<8x48xf32>
    %2 = tpu.matmul %0, %1, %cst {dimension_numbers = #tpu.dot_dimension_numbers<[1], [0], [0], [1], [0, 0, 1, 1], [], []>} : vector<8x3xf32>, vector<3x48xf32>, vector<8x48xf32> -> vector<8x48xf32>
    %c0_3 = arith.constant 0 : index
    %c0_4 = arith.constant 0 : index
    %3 = vector.load %arg3[%c0_3, %c0_4] : memref<1x48xf32, #tpu.memory_space<vmem>>, vector<1x48xf32>
    %4 = vector.broadcast %3 : vector<1x48xf32> to vector<8x48xf32>
    %5 = arith.addf %2, %4 : vector<8x48xf32>
    %6 = math.sin %5 : vector<8x48xf32>
    %c0_5 = arith.constant 0 : index
    %c0_6 = arith.constant 0 : index
    %7 = vector.load %arg4[%c0_5, %c0_6] : memref<48x128xf32, #tpu.memory_space<vmem>>, vector<48x128xf32>
    %cst_7 = arith.constant dense<0.000000e+00> : vector<8x128xf32>
    %8 = tpu.matmul %6, %7, %cst_7 {dimension_numbers = #tpu.dot_dimension_numbers<[1], [0], [0], [1], [0, 0, 1, 1], [], []>} : vector<8x48xf32>, vector<48x128xf32>, vector<8x128xf32> -> vector<8x128xf32>
    %c0_8 = arith.constant 0 : index
    %c0_9 = arith.constant 0 : index
    %9 = vector.load %arg5[%c0_8, %c0_9] : memref<3x128xf32, #tpu.memory_space<vmem>>, vector<3x128xf32>
    %cst_10 = arith.constant dense<0.000000e+00> : vector<8x128xf32>
    %10 = tpu.matmul %0, %9, %cst_10 {dimension_numbers = #tpu.dot_dimension_numbers<[1], [0], [0], [1], [0, 0, 1, 1], [], []>} : vector<8x3xf32>, vector<3x128xf32>, vector<8x128xf32> -> vector<8x128xf32>
    %11 = arith.addf %8, %10 : vector<8x128xf32>
    %c0_11 = arith.constant 0 : index
    %c0_12 = arith.constant 0 : index
    %12 = vector.load %arg6[%c0_11, %c0_12] : memref<8x128xf32, #tpu.memory_space<vmem>>, vector<8x128xf32>
    tpu.vector_store %arg6[%c0_11, %c0_12], %11 {strides = array<i32>} : memref<8x128xf32, #tpu.memory_space<vmem>>, vector<8x128xf32>,
    return
  }
  func.func @transform_0(%arg0: i32) -> (i32, i32) {
    %c0_i32 = arith.constant 0 : i32
    %c0_i32_0 = arith.constant 0 : i32
    return %arg0, %c0_i32 : i32, i32
  }
  func.func @transform_1(%arg0: i32) -> (i32, i32) {
    %c0_i32 = arith.constant 0 : i32
    %c0_i32_0 = arith.constant 0 : i32
    %c0_i32_1 = arith.constant 0 : i32
    return %c0_i32, %c0_i32_0 : i32, i32
  }
  func.func @transform_2(%arg0: i32) -> (i32, i32) {
    %c0_i32 = arith.constant 0 : i32
    %c0_i32_0 = arith.constant 0 : i32
    %c0_i32_1 = arith.constant 0 : i32
    return %c0_i32, %c0_i32_0 : i32, i32
  }
  func.func @transform_3(%arg0: i32) -> (i32, i32) {
    %c0_i32 = arith.constant 0 : i32
    %c0_i32_0 = arith.constant 0 : i32
    %c0_i32_1 = arith.constant 0 : i32
    return %c0_i32, %c0_i32_0 : i32, i32
  }
  func.func @transform_4(%arg0: i32) -> (i32, i32) {
    %c0_i32 = arith.constant 0 : i32
    %c0_i32_0 = arith.constant 0 : i32
    %c0_i32_1 = arith.constant 0 : i32
    return %c0_i32, %c0_i32_0 : i32, i32
  }
  func.func @transform_5(%arg0: i32) -> (i32, i32) {
    %c0_i32 = arith.constant 0 : i32
    %c0_i32_0 = arith.constant 0 : i32
    return %arg0, %c0_i32 : i32, i32
  }
}

</mosaic_0001>

<bundles_post_ra>
// kernel: tpu_custom_call.1
= control target key start
LH: loop header
LB: loop body
LE: loop exit
PB: predicated region body
PF: predicated region fallthrough
CT: control target
= control target key end

     0   :  { %10 = vsyncpa [#allocation3], 0  ;;  %s625_s0 = inlined_call_operand.vmem [shape: f32[8,3], index: 0, kind: input, shape index: {}]   ;;  %s626_s1 = inlined_call_operand.vmem [shape: f32[3,48], index: 1, kind: input, shape index: {}]   ;;  %s627_s2 = inlined_call_operand.vmem [shape: f32[1,48], index: 2, kind: input, shape index: {}]   ;;  %s628_s3 = inlined_call_operand.hbm [shape: f32[48,128], index: 3, kind: input, shape index: {}]   ;;  %s629_s4 = inlined_call_operand.vmem [shape: f32[3,128], index: 4, kind: input, shape index: {}]   ;;  %s630_s5 = inlined_call_operand.hbm [shape: f32[8,128], index: 5, kind: output, shape index: {}]  }
   0x1   :  { %11 = vsyncpa [#allocation4], 0  ;;  %s521_s18 = smov [#allocation2]   ;;  %s473_s22 = scalar_lea.hbm %s628_s3, 768 }
   0x2   :  { %s23_s19 = sshll.u32 %s521_s18, 4  ;;  %p474_p0 = scmp.ne.s32.totalorder %s628_s3, %s473_s22  ;;  %s24_s19 = int_to_ptr.vmem [resolvable:$true] %s23_s19 }
   0x3   :  { %p477_p1 = scmp.lt.u32.totalorder %s473_s22, %s628_s3 }
   0x5   :  { %p479_p2 = pnand %p477_p1, %p474_p0 }
   0x7   :  { %482 = shalt.err (!%p479_p2)
}
   0x8   :  { %s483_s27 = scalar_lea.vmem %s24_s19, 768  ;;  %p488_p4 = scmp.lt.s32.totalorder %s24_s19, %s24_s19 }
   0x9   :  { %p484_p3 = scmp.ne.s32.totalorder %s24_s19, %s483_s27  ;;  %p489_p5 = scmp.lt.s32.totalorder %s483_s27, %s483_s27 }
   0xb   :  { %p490_p6 = por %p489_p5, %p488_p4 }
   0xd   :  { %p491_p7 = pnand %p490_p6, %p484_p3 }
   0xf   :  { %494 = shalt.err (!%p491_p7)
}
  0x10   :  { %s522_s28 = smov 128   ;;  %s523_s29 = smov 8  }
  0x11   :  { %29 = dma.hbm_to_vmem [thread:$0]  %s628_s3, 768, %s24_s19, [#allocation3], %s522_s28, %s522_s28, %s523_s29  }
  0x12   :  { %517 = dma.done.wait [#allocation3], 768  }
  0x13   :  { %518 = vsyncadd [#allocation3], 4294966528  ;;  %v524_v0 = vmov 0.0   ;;  %vm525_vm0 = vmmov 0   ;;  %vm48_vm1 = vcmask 1042432   ;;  %vm44_vm2 = vcmask 23552  }
  0x14   :  { %417 = vmatprep.subr.mxu0 %v524_v0  ;;  %419 = vmatprep.mubr.msk.f32.mxu0 %vm525_vm0, %v524_v0  ;;  %v36_v1 = vld [vmem:[%s626_s1] sm:$0x7]  ;;  %v227_v4 = vld [vmem:[#allocation2 + $0x8] sm:$0xff]  ;;  %v228_v5 = vld [vmem:[#allocation2 + $0x10] sm:$0xff]  ;;  %v526_v6 = vmov 0.0|0.0   ;;  %vm306_vm15 = vcmask 392192  }
  0x15   :  { %439 = vmatprep.mubr.msk.f32.mxu1 %vm525_vm0, %v524_v0  ;;  %v35_v2 = vld [vmem:[%s625_s0] sm:$0xff]  ;;  %418 = vmatpush3.msk.msra.mxu0 %vm48_vm1, %v36_v1  ;;  %v229_v8 = vld [vmem:[#allocation2 + $0x18] sm:$0xff]  ;;  %v231_v12 = vld [vmem:[#allocation2 + $0x28] sm:$0xff]  ;;  %v527_v28 = vmov 683565275  }
  0x16   :  { %420 = vmatmul.mubr.msk.f32.vlgmr.msra.gmra.mrb[0].mxu0 %vm44_vm2, %v35_v2  ;;  %422 = vmatprep.subr.mxu0 %v524_v0  ;;  %v226_v3 = vld [vmem:[#allocation2] sm:$0xff]  ;;  %v446_v10 = vpack.c.bf16 %v229_v8, %v228_v5  ;;  %v528_v30 = vmov 2475754826   ;;  %v529_v33 = vmov 2131351028  }
  0x17   :  { %424 = vmatprep.mubr.msk.f32.mxu0 %vm525_vm0, %v524_v0  ;;  %442 = vmatprep.subr.bf16.mxu1 %v526_v6  ;;  %v443_v7 = vpack.c.bf16 %v227_v4, %v226_v3  ;;  %v232_v9 = vld [vmem:[%s629_s4] sm:$0x7]  ;;  %v530_v36 = vmov 2102212464   ;;  %v531_v39 = vmov 920167782  }
  0x18   :  { %423 = vmatpush3.msk.msra.mxu0 %vm48_vm1, %v232_v9  ;;  %v230_v11 = vld [vmem:[#allocation2 + $0x20] sm:$0xff]  ;;  %v532_v42 = vmov 1326507024  }
  0x19   :  { %444 = vmatpush3.bf16.msra.mxu1 %v443_v7  ;;  %v449_v13 = vpack.c.bf16 %v231_v12, %v230_v11  ;;  %v396_v14 = vld [vmem:[%s627_s2] ss:$0 sm:$0xff]  ;;  %s533_s2 = smov [#allocation5]  }
  0x1a   :  { %425 = vmatmul.mubr.msk.f32.vlgmr.msra.gmra.mrb[2].mxu0 %vm44_vm2, %v35_v2  ;;  %445 = vmatprep.subr.bf16.mxu1 %v526_v6  ;;  %s387_s4 = sshll.u32 %s533_s2, 4  ;;  %s388_s4 = int_to_ptr.vmem [resolvable:$true] %s387_s4 }
  0x1b   :  { %s495_s12 = scalar_lea.vmem %s388_s4, 128  ;;  %p500_p9 = scmp.lt.s32.totalorder %s388_s4, %s388_s4 }
  0x1c   :  { %p496_p8 = scmp.ne.s32.totalorder %s388_s4, %s495_s12  ;;  %p501_p10 = scmp.lt.s32.totalorder %s495_s12, %s495_s12 }
  0x1d   :  { %447 = vmatpush3.bf16.msra.mxu1 %v446_v10 }
  0x1e   :  { %448 = vmatprep.subr.bf16.mxu1 %v526_v6  ;;  %p502_p11 = por %p501_p10, %p500_p9 }
  0x20   :  { %p503_p12 = pnand %p502_p11, %p496_p8 }
  0x21   :  { %450 = vmatpush3.bf16.msra.mxu1 %v449_v13 }
  0xe9   :  { %v118_v15 = vpop.f32.mrb[0].mxu0 }
  0xea   :  { %v592_v16 = vadd.f32 %v396_v14, %v118_v15  ;;  %v421_v17 = vpop.f32.mrb[1].mxu0 }
  0xec   :  { %v125_v18 = vand.u32 2139095040, %v592_v16  ;;  %v122_v22 = vand.u32 2147483647, %v592_v16  ;;  %vm124_vm10 = vcmp.lt.s32.totalorder %v592_v16, 0  ;;  %vm214_vm0 = vweird.f32 %v592_v16 }
  0xee   :  { %v126_v19 = vshrl.u32 %v125_v18, 23  ;;  %v129_v25 = vand.u32 8388607, %v122_v22  ;;  %vm123_vm11 = vcmp.le.f32.partialorder %v122_v22, 0.7853982 }
  0xf0   :  { %v399_v20 = vadd.s32 4294967169, %v126_v19  ;;  %v130_v44 = vor.u32 8388608, %v129_v25 }
  0xf2   :  { %v132_v21 = vadd.s32 1, %v399_v20  ;;  %v170_v58 = vshll.u32 %v130_v44, 8 }
  0xf4   :  { %vm133_vm3 = vcmp.gt.s32.totalorder %v132_v21, 0 }
  0xf5   :  { %v134_v23 = vsel %vm133_vm3, %v132_v21, 0 }
  0xf6   :  { %v136_v24 = vand.u32 31, %v134_v23  ;;  %v135_v27 = vshrl.u32 %v134_v23, 5 }
  0xf8   :  { %v137_v26 = vsub.s32 32, %v136_v24  ;;  %v139_v29 = vshll.u32 %v527_v28, %v136_v24  ;;  %v142_v31 = vshll.u32 %v528_v30, %v136_v24  ;;  %v145_v35 = vshll.u32 %v529_v33, %v136_v24 }
  0xf9   :  { %v148_v38 = vshll.u32 %v530_v36, %v136_v24  ;;  %v151_v41 = vshll.u32 %v531_v39, %v136_v24  ;;  %vm154_vm4 = vcmp.lt.s32.totalorder %v135_v27, 1  ;;  %vm157_vm5 = vcmp.lt.s32.totalorder %v135_v27, 4 }
  0xfa   :  { %v140_v32 = vshrl.u32 %v528_v30, %v137_v26  ;;  %v143_v34 = vshrl.u32 %v529_v33, %v137_v26  ;;  %v146_v37 = vshrl.u32 %v530_v36, %v137_v26  ;;  %v149_v40 = vshrl.u32 %v531_v39, %v137_v26 }
  0xfb   :  { %v152_v43 = vshrl.u32 %v532_v42, %v137_v26  ;;  %v138_v53 = vshrl.u32 %v527_v28, %v137_v26  ;;  %vm156_vm6 = vcmp.lt.s32.totalorder %v135_v27, 3  ;;  %vm155_vm7 = vcmp.lt.s32.totalorder %v135_v27, 2 }
  0xfc   :  { %v141_v45 = vor.u32 %v140_v32, %v139_v29  ;;  %v144_v46 = vor.u32 %v143_v34, %v142_v31  ;;  %v147_v47 = vor.u32 %v146_v37, %v145_v35  ;;  %v150_v48 = vor.u32 %v149_v40, %v148_v38 }
  0xfd   :  { %v153_v49 = vor.u32 %v152_v43, %v151_v41 }
  0xfe   :  { %v159_v50 = vsel %vm157_vm5, %v147_v47, 2102212464  ;;  %v162_v51 = vsel %vm154_vm4, %v141_v45, %v144_v46  ;;  %v166_v52 = vsel %vm154_vm4, %v144_v46, %v147_v47  ;;  %v163_v54 = vsel %vm157_vm5, %v150_v48, 920167782 }
  0xff   :  { %v167_v55 = vsel %vm157_vm5, %v153_v49, 1326507024  ;;  %v164_v56 = vsel %vm156_vm6, %v147_v47, %v163_v54  ;;  %v158_v59 = vsel %vm154_vm4, %v138_v53, %v141_v45  ;;  %v160_v60 = vsel %vm156_vm6, %v144_v46, %v159_v50  ;;  %v302_v46 = vpop.f32.mrb[2].mxu0 }
 0x100   :  { %v168_v57 = vsel %vm156_vm6, %v150_v48, %v167_v55  ;;  %v165_v61 = vsel %vm155_vm7, %v162_v51, %v164_v56  ;;  %v161_v3 = vsel %vm155_vm7, %v158_v59, %v160_v60  ;;  %v426_v47 = vpop.f32.mrb[3].mxu0 }
 0x101   :  { %v169_v62 = vsel %vm155_vm7, %v166_v52, %v168_v57  ;;  %v601_v1 = vmul.u32.u64.low %v170_v58, %v165_v61  ;;  %v602_v2 = vmul.u32.u64.high %v170_v58, %v165_v61, %v601_v1  ;;  %v177_v5 = vmul.u32 %v170_v58, %v161_v3 }
 0x102   :  { %v598_v63 = vmul.u32.u64.low %v170_v58, %v169_v62  ;;  %v599_v0 = vmul.u32.u64.high %v170_v58, %v169_v62, %v598_v63 }
 0x103   :  { %v180_v4 = vadd.s32 1, %v602_v2 }
 0x104   :  { %vm179_vm8 = vc.u32 %v599_v0, %v601_v1  ;;  %v178_v18 = vadd.s32 %v601_v1, %v599_v0 }
 0x105   :  { %v181_v6 = vsel %vm179_vm8, %v180_v4, %v602_v2 }
 0x106   :  { %v182_v7 = vadd.s32 %v181_v6, %v177_v5 }
 0x108   :  { %v183_v8 = vadd.s32 536870912, %v182_v7 }
 0x10a   :  { %v184_v9 = vshrl.u32 %v183_v8, 30 }
 0x10c   :  { %v185_v10 = vshll.u32 %v184_v9, 30  ;;  %v208_v31 = vsub.s32 4, %v184_v9 }
 0x10e   :  { %v186_v11 = vsub.s32 %v182_v7, %v185_v10  ;;  %v209_v34 = vsel %vm124_vm10, %v208_v31, %v184_v9 }
 0x10f   :  { %v211_v36 = vsel %vm123_vm11, 0, %v209_v34 }
 0x110   :  { %v188_v12 = vsub.s32 0, %v186_v11  ;;  %v215_v37 = vadd.s32 3, %v211_v36 }
 0x112   :  { %v400_v13 = vmin.u32 %v188_v12, %v186_v11  ;;  %v216_v38 = vand.u32 3, %v215_v37 }
 0x114   :  { %v190_v14 = vclz %v400_v13  ;;  %vm221_vm12 = vcmp.eq.s32.totalorder %v216_v38, 2  ;;  %vm218_vm13 = vcmp.eq.s32.totalorder %v216_v38, 0  ;;  %vm217_vm14 = vcmp.lt.s32.totalorder %v216_v38, 2 }
 0x116   :  { %v401_v15 = vadd.s32 4294967294, %v190_v14 }
 0x118   :  { %vm402_vm9 = vcmp.lt.s32.totalorder %v401_v15, 0 }
 0x119   :  { %v193_v17 = vsel %vm402_vm9, 0, %v401_v15 }
 0x11a   :  { %v194_v19 = vsub.s32 32, %v193_v17  ;;  %v198_v20 = vsub.s32 4294967266, %v193_v17  ;;  %v195_v21 = vshll.u32 %v186_v11, %v193_v17 }
 0x11c   :  { %v196_v23 = vshrl.u32 %v178_v18, %v194_v19  ;;  %v199_v24 = vadd.s32 127, %v198_v20 }
 0x11e   :  { %v197_v25 = vor.u32 %v196_v23, %v195_v21  ;;  %v200_v26 = vshll.u32 %v199_v24, 23 }
 0x120   :  { %v201_v27 = vor.u32 4788187, %v200_v26  ;;  %v204_v29 = vcvt.s32.f32 %v197_v25 }
 0x122   :  { %v202_v28 = vand.u32 2147483647, %v201_v27 }
 0x124   :  { %v205_v30 = vmul.f32 %v204_v29, %v202_v28 }
 0x126   :  { %v206_v32 = vxor.u32 2147483648, %v205_v30 }
 0x128   :  { %v207_v33 = vsel %vm124_vm10, %v206_v32, %v205_v30 }
 0x129   :  { %v210_v35 = vsel %vm123_vm11, %v592_v16, %v207_v33 }
 0x12a   :  { %469 = vcosq.f32 %v210_v35 }
 0x12b   :  { %471 = vsinq.f32 %v210_v35 }
 0x134   :  { %v470_v39 = vpop.eup %469 }
 0x135   :  { %v472_v40 = vpop.eup %471  ;;  %v222_v41 = vxor.u32 2147483648, %v470_v39 }
 0x136   :  { %v219_v42 = vxor.u32 2147483648, %v472_v40 }
 0x137   :  { %v223_v43 = vsel %vm221_vm12, %v222_v41, %v472_v40 }
 0x138   :  { %v220_v44 = vsel %vm218_vm13, %v470_v39, %v219_v42 }
 0x139   :  { %v224_v22 = vsel %vm217_vm14, %v220_v44, %v223_v43 }
 0x13a   :  { %v225_v45 = vsel %vm214_vm0, nan, %v224_v22 }
 0x13b   :  { %440 = vmatmul.mubr.msk.f32.vlgmr.msra.gmra.mrb[0].mxu1 %vm306_vm15, %v225_v45 }
 0x20e   :  { %v376_v48 = vpop.f32.mrb[0].mxu1 }
 0x20f   :  { %v377_v49 = vadd.f32 %v376_v48, %v302_v46  ;;  %v441_v50 = vpop.f32.mrb[1].mxu1 }
 0x211   :  { %380 = vst [vmem:[#allocation5] sm:$0xff] %v377_v49 }
 0x212   :  { %506 = shalt.err (!%p503_p12)
}
 0x213   :  { %s507_s15 = scalar_lea.hbm %s630_s5, 128 }
 0x214   :  { %p508_p13 = scmp.ne.s32.totalorder %s630_s5, %s507_s15  ;;  %p511_p0 = scmp.lt.u32.totalorder %s507_s15, %s630_s5 }
 0x216   :  { %p513_p1 = pnand %p511_p0, %p508_p13 }
 0x218   :  { %516 = shalt.err (!%p513_p1)
}
 0x219   :  { %390 = dma.vmem_to_hbm [thread:$0]  %s388_s4, 128, %s630_s5, [#allocation4]  }
 0x21a   :  { %519 = dma.done.wait [#allocation4], 128  }
 0x21b   :  { %520 = vsyncadd [#allocation4], 4294967168 }
 0x21c   :  { %394 = vsyncpa [#allocation3], 1 }
 0x21d   :  { %395 = vsyncpa [#allocation4], 1 }

</bundles_post_ra>
